<compile_context>
chip_gen: v7x
topology: tpu7x:2x2x1
jax: 0.10.0
libtpu: 0.0.40
codegen_flags: <defaults>
</compile_context>

<pallas_src>
import jax
import jax.numpy as jnp
from jax.experimental import pallas as pl
from jax.experimental.pallas import tpu as pltpu


def _round_up(x, m):
    return (x + m - 1) // m * m


def _make_blend_kernel(K, C, sigma, clip_inside, ambient, background):
    """Build the layered-RGB-blend kernel (K layers, C color channels).

    `ambient` / `background` are python float tuples baked into the kernel.
    """
    amb = tuple(float(v) for v in ambient)
    bg = tuple(float(v) for v in background)

    def kernel(p2f_ref, dists_ref, tex_ref, out_ref):
        dists = dists_ref[...].astype(jnp.float32)           # (K, Tp)
        mask = (p2f_ref[...] >= 0).astype(jnp.float32)       # (K, Tp)

        # alpha per layer (static python branch on blend config)
        if sigma == 0.0:
            alpha = (dists <= 0.0).astype(jnp.float32) * mask
        elif clip_inside:
            alpha = jnp.exp(-jnp.maximum(dists, 0.0) / sigma) * mask
        else:
            alpha = jax.nn.sigmoid(-dists / sigma) * mask

        tp = dists.shape[-1]
        acc = jnp.zeros((C, tp), jnp.float32)
        occ = jnp.ones((1, tp), jnp.float32)                 # running prod of (1 - alpha)
        for k in range(K):                                   # K is small and static
            a_k = alpha[k:k + 1, :]                          # (1, Tp)
            w_k = occ * a_k                                  # occ_alpha[k] * alpha[k]
            tex_k = tex_ref[k * C:(k + 1) * C, :].astype(jnp.float32)   # (C, Tp)
            acc = acc + w_k * tex_k
            occ = occ * (1.0 - a_k)

        # ambient hoisted out of the K loop; appended background layer
        # (color = bg, alpha = 1, occ_alpha = prod(1 - alpha)) folded per channel.
        for c in range(C):
            out_ref[c:c + 1, :] = amb[c] * acc[c:c + 1, :] + bg[c] * occ
        out_ref[C:C + 1, :] = 1.0 - occ                      # pixel_colors[..., C]

    return kernel


def layered_shader_forward(texels, pix_to_face, dists, *, ambient_color,
                           background_color, sigma=1e-4, clip_inside=True,
                           tile_p=16384):
    """Equivalent of LayeredShader(shading_type='raw').forward.

    texels      : (N, H, W, K, C) float32  -- meshes.sample_textures(fragments)
    pix_to_face : (N, H, W, K)    int32    -- fragments.pix_to_face
    dists       : (N, H, W, K)    float32  -- fragments.dists
    returns     : (N, C+1, H, W)  float32  -- RGBA in NCHW
    """
    N, H, W, K, C = texels.shape
    P = N * H * W

    # glue: flatten pixels onto the lane axis.
    # TODO(synk): producing the (K*C, P)/(K, P) layout upstream (rasterizer
    # output) would remove these XLA-side transposes, which cost more HBM
    # traffic than the kernel itself.
    tex = texels.reshape(P, K * C).T                         # (K*C, P)
    d = dists.reshape(P, K).T                                # (K, P)
    p2f = pix_to_face.reshape(P, K).T.astype(jnp.int32)      # (K, P)

    # compile-time color constants (matches the PyTorch module: background is
    # forced to ones when c_dim != 3, ambient multiply is the 'raw' branch).
    amb = tuple(float(v) for v in jnp.asarray(ambient_color, jnp.float32).reshape(-1))
    if C != 3:
        bg = (1.0,) * C
    else:
        bg = tuple(float(v) for v in jnp.asarray(background_color, jnp.float32).reshape(-1))

    # tiling: large lane tiles for this HBM-bound streaming kernel; pad P up
    # to a tile multiple (never collapse the grid into one giant block).
    tile_p = max(128, min(int(tile_p), _round_up(P, 128)))
    tile_p = _round_up(tile_p, 128)
    P_pad = _round_up(P, tile_p)
    if P_pad != P:
        pad = P_pad - P
        tex = jnp.pad(tex, ((0, 0), (0, pad)))
        d = jnp.pad(d, ((0, 0), (0, pad)))
        p2f = jnp.pad(p2f, ((0, 0), (0, pad)), constant_values=-1)
    grid = (P_pad // tile_p,)

    kernel = _make_blend_kernel(K, C, float(sigma), bool(clip_inside), amb, bg)

    cost = pl.CostEstimate(
        flops=K * (3 * C + 4) * P,
        transcendentals=(K * P if sigma != 0.0 else 0),
        bytes_accessed=(4 * K + 4 * K + 4 * K * C + 4 * (C + 1)) * P,
    )

    out = pl.pallas_call(
        kernel,
        out_shape=jax.ShapeDtypeStruct((C + 1, P_pad), jnp.float32),
        grid_spec=pltpu.PrefetchScalarGridSpec(
            num_scalar_prefetch=0,
            grid=grid,
            in_specs=[
                pl.BlockSpec((K, tile_p), lambda p: (0, p)),         # pix_to_face
                pl.BlockSpec((K, tile_p), lambda p: (0, p)),         # dists
                pl.BlockSpec((K * C, tile_p), lambda p: (0, p)),     # texels (dense sublanes)
            ],
            out_specs=pl.BlockSpec((C + 1, tile_p), lambda p: (0, p)),
        ),
        compiler_params=pltpu.CompilerParams(
            dimension_semantics=("parallel",)),
        cost_estimate=cost,
    )(p2f, d, tex)

    out = out[:, :P]
    # (C+1, P) -> (N, C+1, H, W)  == pixel_colors.permute(0, 3, 1, 2)
    return jnp.transpose(out.reshape(C + 1, N, H, W), (1, 0, 2, 3))


def _reference(texels, pix_to_face, dists, ambient, background, sigma, clip_inside):
    """Pure-JAX port of layered_rgb_blend + raw shading, for correctness check."""
    colors = texels * ambient[None, None, None, None, :]
    mask = (pix_to_face >= 0).astype(jnp.float32)
    if sigma == 0.0:
        alpha = (dists <= 0.0).astype(jnp.float32) * mask
    elif clip_inside:
        alpha = jnp.exp(-jnp.clip(dists, 0.0, None) / sigma) * mask
    else:
        alpha = jax.nn.sigmoid(-dists / sigma) * mask
    N, H, W, K = dists.shape
    occ = jnp.cumprod(1.0 - alpha, axis=-1)
    occ = jnp.concatenate([jnp.ones((N, H, W, 1), jnp.float32), occ], axis=-1)
    colors = jnp.concatenate(
        [colors, jnp.broadcast_to(background, (N, H, W, 1, colors.shape[-1]))], axis=-2)
    alpha = jnp.concatenate([alpha, jnp.ones((N, H, W, 1), jnp.float32)], axis=-1)
    rgb = (occ[..., None] * alpha[..., None] * colors).sum(-2)
    a = 1.0 - occ[..., -1]
    px = jnp.concatenate([rgb, a[..., None]], axis=-1)
    return jnp.transpose(px, (0, 3, 1, 2))


if __name__ == "__main__":
    # Small shapes consistent with the module's forward: N images, H x W raster,
    # K faces per pixel, C color channels.
    N, H, W, K, C = 2, 16, 16, 8, 3
    sigma = 1e-4
    clip_inside = True

    key = jax.random.PRNGKey(0)
    k1, k2, k3 = jax.random.split(key, 3)

    # synthetic "fragments" + "sampled textures"
    texels = jax.random.uniform(k1, (N, H, W, K, C), dtype=jnp.float32)
    dists = 2e-4 * jax.random.normal(k2, (N, H, W, K), dtype=jnp.float32)
    pix_to_face = jax.random.randint(k3, (N, H, W, K), -1, 50, dtype=jnp.int32)

    # deterministic "parameters" (DirectionalLights.ambient_color, BlendParams.background_color)
    ambient_color = jnp.full((C,), 0.5, dtype=jnp.float32)
    background_color = jnp.ones((C,), dtype=jnp.float32)

    out = layered_shader_forward(
        texels, pix_to_face, dists,
        ambient_color=ambient_color, background_color=background_color,
        sigma=sigma, clip_inside=clip_inside)
    out = jax.block_until_ready(out)

    ref = _reference(texels, pix_to_face, dists, ambient_color,
                     background_color, sigma, clip_inside)
    assert out.shape == (N, C + 1, H, W), out.shape
    assert jnp.allclose(out, ref, atol=1e-5, rtol=1e-5), float(jnp.abs(out - ref).max())

    print("KERNEL_OK")
</pallas_src>

<mosaic_0001>
module attributes {stable_mosaic.version = 11 : i64} {
  func.func @kernel(%arg0: i32, %arg1: memref<8x512xi32, #tpu.memory_space<vmem>>, %arg2: memref<8x512xf32, #tpu.memory_space<vmem>>, %arg3: memref<24x512xf32, #tpu.memory_space<vmem>>, %arg4: memref<4x512xf32, #tpu.memory_space<vmem>>) attributes {dimension_semantics = [#tpu.dimension_semantics<parallel>], iteration_bounds = array<i64: 1>, scalar_prefetch = 0 : i64, scratch_operands = 0 : i64, tpu.core_type = #tpu.core_type<tc>, window_params = [{transform_indices = @transform_0, window_bounds = array<i64: 8, 512>}, {transform_indices = @transform_1, window_bounds = array<i64: 8, 512>}, {transform_indices = @transform_2, window_bounds = array<i64: 24, 512>}, {transform_indices = @transform_3, window_bounds = array<i64: 4, 512>}]} {
    %c0 = arith.constant 0 : index
    %c0_0 = arith.constant 0 : index
    %0 = vector.load %arg2[%c0, %c0_0] : memref<8x512xf32, #tpu.memory_space<vmem>>, vector<8x512xf32>
    %c0_1 = arith.constant 0 : index
    %c0_2 = arith.constant 0 : index
    %1 = vector.load %arg1[%c0_1, %c0_2] : memref<8x512xi32, #tpu.memory_space<vmem>>, vector<8x512xi32>
    %c0_i32 = arith.constant 0 : i32
    %2 = vector.broadcast %c0_i32 : i32 to vector<8x512xi32>
    %3 = arith.cmpi sge, %1, %2 : vector<8x512xi32>
    %4 = arith.extui %3 : vector<8x512xi1> to vector<8x512xi32>
    %5 = arith.sitofp %4 : vector<8x512xi32> to vector<8x512xf32>
    %cst = arith.constant 0.000000e+00 : f32
    %6 = vector.broadcast %cst : f32 to vector<8x512xf32>
    %7 = arith.maximumf %0, %6 : vector<8x512xf32>
    %cst_3 = arith.constant 0.000000e+00 : f32
    %8 = vector.broadcast %cst_3 : f32 to vector<8x512xf32>
    %9 = arith.subf %8, %7 : vector<8x512xf32>
    %cst_4 = arith.constant 9.99999974E-5 : f32
    %10 = vector.broadcast %cst_4 : f32 to vector<8x512xf32>
    %11 = arith.divf %9, %10 : vector<8x512xf32>
    %12 = math.exp %11 : vector<8x512xf32>
    %13 = arith.mulf %12, %5 : vector<8x512xf32>
    %cst_5 = arith.constant 0.000000e+00 : f32
    %14 = vector.broadcast %cst_5 : f32 to vector<3x512xf32>
    %cst_6 = arith.constant 1.000000e+00 : f32
    %15 = vector.broadcast %cst_6 : f32 to vector<1x512xf32>
    %16 = vector.extract_strided_slice %13 {offsets = [0, 0], sizes = [1, 512], strides = [1, 1]} : vector<8x512xf32> to vector<1x512xf32>
    %17 = arith.mulf %15, %16 : vector<1x512xf32>
    %c0_7 = arith.constant 0 : index
    %c0_8 = arith.constant 0 : index
    %18 = vector.load %arg3[%c0_7, %c0_8] : memref<24x512xf32, #tpu.memory_space<vmem>>, vector<3x512xf32>
    %19 = vector.broadcast %17 : vector<1x512xf32> to vector<3x512xf32>
    %20 = arith.mulf %19, %18 : vector<3x512xf32>
    %21 = arith.addf %14, %20 : vector<3x512xf32>
    %cst_9 = arith.constant 1.000000e+00 : f32
    %22 = vector.broadcast %cst_9 : f32 to vector<1x512xf32>
    %23 = arith.subf %22, %16 : vector<1x512xf32>
    %24 = arith.mulf %15, %23 : vector<1x512xf32>
    %25 = vector.extract_strided_slice %13 {offsets = [1, 0], sizes = [1, 512], strides = [1, 1]} : vector<8x512xf32> to vector<1x512xf32>
    %26 = arith.mulf %24, %25 : vector<1x512xf32>
    %c3 = arith.constant 3 : index
    %c0_10 = arith.constant 0 : index
    %27 = vector.load %arg3[%c3, %c0_10] : memref<24x512xf32, #tpu.memory_space<vmem>>, vector<3x512xf32>
    %28 = vector.broadcast %26 : vector<1x512xf32> to vector<3x512xf32>
    %29 = arith.mulf %28, %27 : vector<3x512xf32>
    %30 = arith.addf %21, %29 : vector<3x512xf32>
    %cst_11 = arith.constant 1.000000e+00 : f32
    %31 = vector.broadcast %cst_11 : f32 to vector<1x512xf32>
    %32 = arith.subf %31, %25 : vector<1x512xf32>
    %33 = arith.mulf %24, %32 : vector<1x512xf32>
    %34 = vector.extract_strided_slice %13 {offsets = [2, 0], sizes = [1, 512], strides = [1, 1]} : vector<8x512xf32> to vector<1x512xf32>
    %35 = arith.mulf %33, %34 : vector<1x512xf32>
    %c6 = arith.constant 6 : index
    %c0_12 = arith.constant 0 : index
    %36 = vector.load %arg3[%c6, %c0_12] : memref<24x512xf32, #tpu.memory_space<vmem>>, vector<3x512xf32>
    %37 = vector.broadcast %35 : vector<1x512xf32> to vector<3x512xf32>
    %38 = arith.mulf %37, %36 : vector<3x512xf32>
    %39 = arith.addf %30, %38 : vector<3x512xf32>
    %cst_13 = arith.constant 1.000000e+00 : f32
    %40 = vector.broadcast %cst_13 : f32 to vector<1x512xf32>
    %41 = arith.subf %40, %34 : vector<1x512xf32>
    %42 = arith.mulf %33, %41 : vector<1x512xf32>
    %43 = vector.extract_strided_slice %13 {offsets = [3, 0], sizes = [1, 512], strides = [1, 1]} : vector<8x512xf32> to vector<1x512xf32>
    %44 = arith.mulf %42, %43 : vector<1x512xf32>
    %c9 = arith.constant 9 : index
    %c0_14 = arith.constant 0 : index
    %45 = vector.load %arg3[%c9, %c0_14] : memref<24x512xf32, #tpu.memory_space<vmem>>, vector<3x512xf32>
    %46 = vector.broadcast %44 : vector<1x512xf32> to vector<3x512xf32>
    %47 = arith.mulf %46, %45 : vector<3x512xf32>
    %48 = arith.addf %39, %47 : vector<3x512xf32>
    %cst_15 = arith.constant 1.000000e+00 : f32
    %49 = vector.broadcast %cst_15 : f32 to vector<1x512xf32>
    %50 = arith.subf %49, %43 : vector<1x512xf32>
    %51 = arith.mulf %42, %50 : vector<1x512xf32>
    %52 = vector.extract_strided_slice %13 {offsets = [4, 0], sizes = [1, 512], strides = [1, 1]} : vector<8x512xf32> to vector<1x512xf32>
    %53 = arith.mulf %51, %52 : vector<1x512xf32>
    %c12 = arith.constant 12 : index
    %c0_16 = arith.constant 0 : index
    %54 = vector.load %arg3[%c12, %c0_16] : memref<24x512xf32, #tpu.memory_space<vmem>>, vector<3x512xf32>
    %55 = vector.broadcast %53 : vector<1x512xf32> to vector<3x512xf32>
    %56 = arith.mulf %55, %54 : vector<3x512xf32>
    %57 = arith.addf %48, %56 : vector<3x512xf32>
    %cst_17 = arith.constant 1.000000e+00 : f32
    %58 = vector.broadcast %cst_17 : f32 to vector<1x512xf32>
    %59 = arith.subf %58, %52 : vector<1x512xf32>
    %60 = arith.mulf %51, %59 : vector<1x512xf32>
    %61 = vector.extract_strided_slice %13 {offsets = [5, 0], sizes = [1, 512], strides = [1, 1]} : vector<8x512xf32> to vector<1x512xf32>
    %62 = arith.mulf %60, %61 : vector<1x512xf32>
    %c15 = arith.constant 15 : index
    %c0_18 = arith.constant 0 : index
    %63 = vector.load %arg3[%c15, %c0_18] : memref<24x512xf32, #tpu.memory_space<vmem>>, vector<3x512xf32>
    %64 = vector.broadcast %62 : vector<1x512xf32> to vector<3x512xf32>
    %65 = arith.mulf %64, %63 : vector<3x512xf32>
    %66 = arith.addf %57, %65 : vector<3x512xf32>
    %cst_19 = arith.constant 1.000000e+00 : f32
    %67 = vector.broadcast %cst_19 : f32 to vector<1x512xf32>
    %68 = arith.subf %67, %61 : vector<1x512xf32>
    %69 = arith.mulf %60, %68 : vector<1x512xf32>
    %70 = vector.extract_strided_slice %13 {offsets = [6, 0], sizes = [1, 512], strides = [1, 1]} : vector<8x512xf32> to vector<1x512xf32>
    %71 = arith.mulf %69, %70 : vector<1x512xf32>
    %c18 = arith.constant 18 : index
    %c0_20 = arith.constant 0 : index
    %72 = vector.load %arg3[%c18, %c0_20] : memref<24x512xf32, #tpu.memory_space<vmem>>, vector<3x512xf32>
    %73 = vector.broadcast %71 : vector<1x512xf32> to vector<3x512xf32>
    %74 = arith.mulf %73, %72 : vector<3x512xf32>
    %75 = arith.addf %66, %74 : vector<3x512xf32>
    %cst_21 = arith.constant 1.000000e+00 : f32
    %76 = vector.broadcast %cst_21 : f32 to vector<1x512xf32>
    %77 = arith.subf %76, %70 : vector<1x512xf32>
    %78 = arith.mulf %69, %77 : vector<1x512xf32>
    %79 = vector.extract_strided_slice %13 {offsets = [7, 0], sizes = [1, 512], strides = [1, 1]} : vector<8x512xf32> to vector<1x512xf32>
    %80 = arith.mulf %78, %79 : vector<1x512xf32>
    %c21 = arith.constant 21 : index
    %c0_22 = arith.constant 0 : index
    %81 = vector.load %arg3[%c21, %c0_22] : memref<24x512xf32, #tpu.memory_space<vmem>>, vector<3x512xf32>
    %82 = vector.broadcast %80 : vector<1x512xf32> to vector<3x512xf32>
    %83 = arith.mulf %82, %81 : vector<3x512xf32>
    %84 = arith.addf %75, %83 : vector<3x512xf32>
    %cst_23 = arith.constant 1.000000e+00 : f32
    %85 = vector.broadcast %cst_23 : f32 to vector<1x512xf32>
    %86 = arith.subf %85, %79 : vector<1x512xf32>
    %87 = arith.mulf %78, %86 : vector<1x512xf32>
    %88 = vector.extract_strided_slice %84 {offsets = [0, 0], sizes = [1, 512], strides = [1, 1]} : vector<3x512xf32> to vector<1x512xf32>
    %cst_24 = arith.constant 5.000000e-01 : f32
    %89 = vector.broadcast %cst_24 : f32 to vector<1x512xf32>
    %90 = arith.mulf %89, %88 : vector<1x512xf32>
    %cst_25 = arith.constant 1.000000e+00 : f32
    %91 = vector.broadcast %cst_25 : f32 to vector<1x512xf32>
    %92 = arith.mulf %91, %87 : vector<1x512xf32>
    %93 = arith.addf %90, %92 : vector<1x512xf32>
    %c0_26 = arith.constant 0 : index
    %c0_27 = arith.constant 0 : index
    %94 = vector.load %arg4[%c0_26, %c0_27] : memref<4x512xf32, #tpu.memory_space<vmem>>, vector<1x512xf32>
    tpu.vector_store %arg4[%c0_26, %c0_27], %93 {strides = array<i32>} : memref<4x512xf32, #tpu.memory_space<vmem>>, vector<1x512xf32>,
    %95 = vector.extract_strided_slice %84 {offsets = [1, 0], sizes = [1, 512], strides = [1, 1]} : vector<3x512xf32> to vector<1x512xf32>
    %cst_28 = arith.constant 5.000000e-01 : f32
    %96 = vector.broadcast %cst_28 : f32 to vector<1x512xf32>
    %97 = arith.mulf %96, %95 : vector<1x512xf32>
    %cst_29 = arith.constant 1.000000e+00 : f32
    %98 = vector.broadcast %cst_29 : f32 to vector<1x512xf32>
    %99 = arith.mulf %98, %87 : vector<1x512xf32>
    %100 = arith.addf %97, %99 : vector<1x512xf32>
    %c1 = arith.constant 1 : index
    %c0_30 = arith.constant 0 : index
    %101 = vector.load %arg4[%c1, %c0_30] : memref<4x512xf32, #tpu.memory_space<vmem>>, vector<1x512xf32>
    tpu.vector_store %arg4[%c1, %c0_30], %100 {strides = array<i32>} : memref<4x512xf32, #tpu.memory_space<vmem>>, vector<1x512xf32>,
    %102 = vector.extract_strided_slice %84 {offsets = [2, 0], sizes = [1, 512], strides = [1, 1]} : vector<3x512xf32> to vector<1x512xf32>
    %cst_31 = arith.constant 5.000000e-01 : f32
    %103 = vector.broadcast %cst_31 : f32 to vector<1x512xf32>
    %104 = arith.mulf %103, %102 : vector<1x512xf32>
    %cst_32 = arith.constant 1.000000e+00 : f32
    %105 = vector.broadcast %cst_32 : f32 to vector<1x512xf32>
    %106 = arith.mulf %105, %87 : vector<1x512xf32>
    %107 = arith.addf %104, %106 : vector<1x512xf32>
    %c2 = arith.constant 2 : index
    %c0_33 = arith.constant 0 : index
    %108 = vector.load %arg4[%c2, %c0_33] : memref<4x512xf32, #tpu.memory_space<vmem>>, vector<1x512xf32>
    tpu.vector_store %arg4[%c2, %c0_33], %107 {strides = array<i32>} : memref<4x512xf32, #tpu.memory_space<vmem>>, vector<1x512xf32>,
    %cst_34 = arith.constant 1.000000e+00 : f32
    %109 = vector.broadcast %cst_34 : f32 to vector<1x512xf32>
    %110 = arith.subf %109, %87 : vector<1x512xf32>
    %c3_35 = arith.constant 3 : index
    %c0_36 = arith.constant 0 : index
    %111 = vector.load %arg4[%c3_35, %c0_36] : memref<4x512xf32, #tpu.memory_space<vmem>>, vector<1x512xf32>
    tpu.vector_store %arg4[%c3_35, %c0_36], %110 {strides = array<i32>} : memref<4x512xf32, #tpu.memory_space<vmem>>, vector<1x512xf32>,
    return
  }
  func.func @transform_0(%arg0: i32) -> (i32, i32) {
    %c0_i32 = arith.constant 0 : i32
    %c0_i32_0 = arith.constant 0 : i32
    return %c0_i32, %arg0 : i32, i32
  }
  func.func @transform_1(%arg0: i32) -> (i32, i32) {
    %c0_i32 = arith.constant 0 : i32
    %c0_i32_0 = arith.constant 0 : i32
    return %c0_i32, %arg0 : i32, i32
  }
  func.func @transform_2(%arg0: i32) -> (i32, i32) {
    %c0_i32 = arith.constant 0 : i32
    %c0_i32_0 = arith.constant 0 : i32
    return %c0_i32, %arg0 : i32, i32
  }
  func.func @transform_3(%arg0: i32) -> (i32, i32) {
    %c0_i32 = arith.constant 0 : i32
    %c0_i32_0 = arith.constant 0 : i32
    return %c0_i32, %arg0 : i32, i32
  }
}

</mosaic_0001>

<bundles_post_ra>
// kernel: tpu_custom_call.1
= control target key start
LH: loop header
LB: loop body
LE: loop exit
PB: predicated region body
PF: predicated region fallthrough
CT: control target
= control target key end

     0   :  { %8 = vsyncpa [#allocation3], 0  ;;  %s1159_s0 = inlined_call_operand.hbm [shape: s32[8,512], index: 0, kind: input, shape index: {}]   ;;  %s1160_s1 = inlined_call_operand.hbm [shape: f32[8,512], index: 1, kind: input, shape index: {}]   ;;  %s1161_s2 = inlined_call_operand.hbm [shape: f32[24,512], index: 2, kind: input, shape index: {}]   ;;  %s1162_s3 = inlined_call_operand.hbm [shape: f32[4,512], index: 3, kind: output, shape index: {}]  }
   0x1   :  { %9 = vsyncpa [#allocation6], 0 }
   0x2   :  { %10 = vsyncpa [#allocation4], 0  ;;  %s925_s12 = smov [#allocation5]   ;;  %s926_s14 = smov [#allocation2]  }
   0x3   :  { %s27_s13 = sshll.u32 %s925_s12, 4  ;;  %s17_s15 = sshll.u32 %s926_s14, 4  ;;  %s28_s13 = int_to_ptr.vmem [resolvable:$true] %s27_s13  ;;  %s18_s15 = int_to_ptr.vmem [resolvable:$true] %s17_s15 }
   0x4   :  { %s831_s18 = scalar_lea.hbm %s1160_s1, 512 }
   0x5   :  { %p832_p0 = scmp.ne.s32.totalorder %s1160_s1, %s831_s18  ;;  %p835_p1 = scmp.lt.u32.totalorder %s831_s18, %s1160_s1 }
   0x7   :  { %p837_p2 = pnand %p835_p1, %p832_p0 }
   0x9   :  { %840 = shalt.err (!%p837_p2)
}
   0xa   :  { %s841_s23 = scalar_lea.vmem %s28_s13, 512  ;;  %p846_p4 = scmp.lt.s32.totalorder %s28_s13, %s28_s13 }
   0xb   :  { %p842_p3 = scmp.ne.s32.totalorder %s28_s13, %s841_s23  ;;  %p847_p5 = scmp.lt.s32.totalorder %s841_s23, %s841_s23 }
   0xd   :  { %p848_p6 = por %p847_p5, %p846_p4 }
   0xf   :  { %p849_p7 = pnand %p848_p6, %p842_p3 }
  0x11   :  { %852 = shalt.err (!%p849_p7)
}
  0x12   :  { %30 = dma.hbm_to_vmem [thread:$0]  %s1160_s1, 512, %s28_s13, [#allocation6]  }
  0x13   :  { %s853_s28 = scalar_lea.hbm %s1159_s0, 512 }
  0x14   :  { %p854_p8 = scmp.ne.s32.totalorder %s1159_s0, %s853_s28  ;;  %p857_p9 = scmp.lt.u32.totalorder %s853_s28, %s1159_s0 }
  0x16   :  { %p859_p10 = pnand %p857_p9, %p854_p8 }
  0x18   :  { %862 = shalt.err (!%p859_p10)
}
  0x19   :  { %s863_s6 = scalar_lea.vmem %s18_s15, 512  ;;  %p868_p12 = scmp.lt.s32.totalorder %s18_s15, %s18_s15 }
  0x1a   :  { %p864_p11 = scmp.ne.s32.totalorder %s18_s15, %s863_s6  ;;  %p869_p13 = scmp.lt.s32.totalorder %s863_s6, %s863_s6 }
  0x1c   :  { %p870_p0 = por %p869_p13, %p868_p12 }
  0x1e   :  { %p871_p1 = pnand %p870_p0, %p864_p11 }
  0x20   :  { %874 = shalt.err (!%p871_p1)
}
  0x21   :  { %20 = dma.hbm_to_vmem [thread:$0]  %s1159_s0, 512, %s18_s15, [#allocation3]  }
  0x22   :  { %s927_s8 = smov [#allocation7]   ;;  %s875_s12 = scalar_lea.hbm %s1161_s2, 1536 }
  0x23   :  { %s36_s9 = sshll.u32 %s927_s8, 4  ;;  %p876_p2 = scmp.ne.s32.totalorder %s1161_s2, %s875_s12  ;;  %s37_s9 = int_to_ptr.vmem [resolvable:$true] %s36_s9 }
  0x24   :  { %p879_p3 = scmp.lt.u32.totalorder %s875_s12, %s1161_s2 }
  0x26   :  { %p881_p4 = pnand %p879_p3, %p876_p2 }
  0x28   :  { %884 = shalt.err (!%p881_p4)
}
  0x29   :  { %s885_s18 = scalar_lea.vmem %s37_s9, 1536  ;;  %p890_p6 = scmp.lt.s32.totalorder %s37_s9, %s37_s9 }
  0x2a   :  { %p886_p5 = scmp.ne.s32.totalorder %s37_s9, %s885_s18  ;;  %p891_p7 = scmp.lt.s32.totalorder %s885_s18, %s885_s18 }
  0x2c   :  { %p892_p8 = por %p891_p7, %p890_p6 }
  0x2e   :  { %p893_p9 = pnand %p892_p8, %p886_p5 }
  0x30   :  { %896 = shalt.err (!%p893_p9)
}
  0x31   :  { %s928_s0 = smov 512   ;;  %s929_s15 = smov 32  }
  0x32   :  { %42 = dma.hbm_to_vmem [thread:$0]  %s1161_s2, 1536, %s37_s9, [#allocation6], %s928_s0, %s928_s0, %s929_s15  }
  0x33   :  { %919 = dma.done.wait [#allocation3], 512  }
  0x34   :  { %920 = vsyncadd [#allocation3], 4294966784 }
  0x35   :  { %921 = dma.done.wait [#allocation6], 2048  }
  0x36   :  { %922 = vsyncadd [#allocation6], 4294965248  ;;  %v52_v0 = vld [vmem:[#allocation5] sm:$0xff]  ;;  %v53_v1 = vld [vmem:[#allocation5 + $0x8] sm:$0xff]  ;;  %v101_v22 = vlaneseq  ;;  %v930_v24 = vmov 1966171168  }
  0x37   :  { %v54_v2 = vld [vmem:[#allocation5 + $0x10] sm:$0xff]  ;;  %v55_v3 = vld [vmem:[#allocation5 + $0x18] sm:$0xff]  ;;  %v72_v4 = vmax.f32 %v52_v0, 0.0  ;;  %v73_v5 = vmax.f32 %v53_v1, 0.0  ;;  %v56_v20 = vld [vmem:[#allocation2] sm:$0xff]  ;;  %v642_v25 = vunpack.c.l.s4 %v930_v24  ;;  %v931_v28 = vmov 0.0  }
  0x38   :  { %v74_v6 = vmax.f32 %v54_v2, 0.0  ;;  %v75_v7 = vmax.f32 %v55_v3, 0.0  ;;  %v57_v21 = vld [vmem:[#allocation2 + $0x8] sm:$0xff]  ;;  %v58_v23 = vld [vmem:[#allocation2 + $0x10] sm:$0xff]  ;;  %v59_v26 = vld [vmem:[#allocation2 + $0x18] sm:$0xff]  ;;  %vm60_vm0 = vcmp.ge.s32.totalorder %v56_v20, 0 }
  0x39   :  { %v76_v8 = vsub.f32 0.0, %v72_v4  ;;  %v77_v9 = vsub.f32 0.0, %v73_v5  ;;  %vm61_vm1 = vcmp.ge.s32.totalorder %v57_v21, 0  ;;  %vm62_vm2 = vcmp.ge.s32.totalorder %v58_v23, 0  ;;  %v97_v40 = vld [vmem:[#allocation7] sm:$0x7] }
  0x3a   :  { %v78_v10 = vsub.f32 0.0, %v74_v6  ;;  %v79_v11 = vsub.f32 0.0, %v75_v7  ;;  %v102_v27 = vshrl.u32 %v101_v22, 7  ;;  %vm63_vm3 = vcmp.ge.s32.totalorder %v59_v26, 0  ;;  %v98_v44 = vld [vmem:[#allocation7 + $0x8] sm:$0x7] }
  0x3b   :  { %v81_v12 = vmul.f32 10000.0, %v76_v8  ;;  %v82_v13 = vmul.f32 10000.0, %v77_v9  ;;  %v811_v29 = vsel %vm60_vm0, 1.0, %v931_v28  ;;  %v643_v30 = vunpack.c.0.s8 %v642_v25  ;;  %v99_v49 = vld [vmem:[#allocation7 + $0x10] sm:$0x7]  ;;  %s932_s2 = smov [#allocation8]  }
  0x3c   :  { %v83_v14 = vmul.f32 10000.0, %v78_v10  ;;  %v84_v15 = vmul.f32 10000.0, %v79_v11  ;;  %v812_v31 = vsel %vm61_vm1, 1.0, %v931_v28  ;;  %v813_v33 = vsel %vm62_vm2, 1.0, %v931_v28  ;;  %v100_v53 = vld [vmem:[#allocation7 + $0x18] sm:$0x7] }
  0x3d   :  { %v85_v16 = vmul.f32 1.442695, %v81_v12  ;;  %v87_v17 = vmul.f32 1.442695, %v82_v13  ;;  %v814_v35 = vsel %vm63_vm3, 1.0, %v931_v28  ;;  %v992_v37 = vsub.s32 0, %v102_v27 }
  0x3e   :  { %v89_v18 = vmul.f32 1.442695, %v83_v14  ;;  %v91_v19 = vmul.f32 1.442695, %v84_v15  ;;  %v996_v41 = vsub.s32 %v643_v30, %v102_v27  ;;  %v145_v2 = vld [vmem:[#allocation7] sm:$0x38] }
  0x3f   :  { %823 = vpow2.f32 %v85_v16  ;;  %v146_v5 = vld [vmem:[#allocation7 + $0x8] sm:$0x38]  ;;  %v147_v6 = vld [vmem:[#allocation7 + $0x10] sm:$0x38]  ;;  %v148_v9 = vld [vmem:[#allocation7 + $0x18] sm:$0x38] }
  0x40   :  { %825 = vpow2.f32 %v87_v17  ;;  %vm253_vm4 = vcmask 1041408   ;;  %vm466_vm5 = vcmask 1040384   ;;  %vm1129_vm6 = vcmp.lt.s32.totalorder %v101_v22, 512  ;;  %s801_s21 = sshll.u32 %s932_s2, 4  ;;  %s802_s21 = int_to_ptr.vmem [resolvable:$true] %s801_s21 }
  0x41   :  { %827 = vpow2.f32 %v89_v18  ;;  %s897_s22 = scalar_lea.vmem %s802_s21, 256  ;;  %p902_p11 = scmp.lt.s32.totalorder %s802_s21, %s802_s21 }
  0x42   :  { %829 = vpow2.f32 %v91_v19  ;;  %p898_p10 = scmp.ne.s32.totalorder %s802_s21, %s897_s22  ;;  %p903_p12 = scmp.lt.s32.totalorder %s897_s22, %s897_s22 }
  0x44   :  { %p904_p13 = por %p903_p12, %p902_p11 }
  0x46   :  { %p905_p0 = pnand %p904_p13, %p898_p10 }
  0x49   :  { %v824_v32 = vpop.eup %823 }
  0x4a   :  { %v826_v34 = vpop.eup %825  ;;  %v990_v36 = vmul.f32 %v824_v32, %v811_v29 }
  0x4b   :  { %v828_v38 = vpop.eup %827  ;;  %v994_v39 = vmul.f32 %v826_v34, %v812_v31 }
  0x4c   :  { %v830_v42 = vpop.eup %829  ;;  %v998_v43 = vmul.f32 %v828_v38, %v813_v33  ;;  %v104_v45 = vrot.slane %v990_v36, %v992_v37  ;;  %v1003_v46 = vsub.f32 1.0, %v990_v36  ;;  %v133_v47 = vrot.slane %v990_v36, 1 }
  0x4d   :  { %v1006_v48 = vmul.f32 %v830_v42, %v814_v35  ;;  %v108_v50 = vrot.slane %v994_v39, %v992_v37  ;;  %v1011_v51 = vsub.f32 1.0, %v994_v39  ;;  %v134_v52 = vrot.slane %v994_v39, 1  ;;  %v213_v35 = vld [vmem:[#allocation7] sm:$0xc0] }
  0x4e   :  { %v112_v54 = vrot.slane %v998_v43, %v992_v37  ;;  %v117_v55 = vmul.f32 %v104_v45, %v97_v40  ;;  %v1017_v56 = vsub.f32 1.0, %v998_v43  ;;  %v135_v57 = vrot.slane %v998_v43, 1  ;;  %v214_v45 = vld [vmem:[#allocation7 + $0x8] sm:$0xc0] }
  0x4f   :  { %v116_v58 = vrot.slane %v1006_v48, %v992_v37  ;;  %v118_v59 = vmul.f32 %v108_v50, %v98_v44  ;;  %v1023_v60 = vsub.f32 1.0, %v1006_v48  ;;  %v136_v61 = vrot.slane %v1006_v48, 1 }
  0x50   :  { %v119_v62 = vmul.f32 %v112_v54, %v99_v49  ;;  %v141_v63 = vmul.f32 %v133_v47, %v1003_v46  ;;  %v142_v0 = vmul.f32 %v134_v52, %v1011_v51  ;;  %v143_v1 = vmul.f32 %v135_v57, %v1017_v56  ;;  %v215_v47 = vld [vmem:[#allocation7 + $0x10] sm:$0xc0]  ;;  %v217_v49 = vld [vmem:[#allocation7 + $0x20] sm:$0x1]  ;;  %v218_v54 = vld [vmem:[#allocation7 + $0x28] sm:$0x1] }
  0x51   :  { %v120_v3 = vmul.f32 %v116_v58, %v100_v53  ;;  %v144_v4 = vmul.f32 %v136_v61, %v1023_v60  ;;  %v189_v7 = vrot.slane %v1003_v46, 1  ;;  %v190_v8 = vrot.slane %v1011_v51, 1  ;;  %v216_v53 = vld [vmem:[#allocation7 + $0x18] sm:$0xc0]  ;;  %v219_v57 = vld [vmem:[#allocation7 + $0x30] sm:$0x1] }
  0x52   :  { %v152_v10 = vrot.slane %v141_v63, %v992_v37  ;;  %v156_v11 = vrot.slane %v142_v0, %v992_v37  ;;  %v160_v12 = vrot.slane %v143_v1, %v992_v37  ;;  %v191_v13 = vrot.slane %v1017_v56, 1  ;;  %v220_v63 = vld [vmem:[#allocation7 + $0x38] sm:$0x1] }
  0x53   :  { %v164_v14 = vrot.slane %v144_v4, %v992_v37  ;;  %v192_v15 = vrot.slane %v1023_v60, 1  ;;  %v197_v16 = vmul.f32 %v189_v7, %v1003_v46  ;;  %v198_v17 = vmul.f32 %v190_v8, %v1011_v51 }
  0x54   :  { %v165_v18 = vmul.f32 %v152_v10, %v145_v2  ;;  %v166_v19 = vmul.f32 %v156_v11, %v146_v5  ;;  %v167_v20 = vmul.f32 %v160_v12, %v147_v6  ;;  %v199_v21 = vmul.f32 %v191_v13, %v1017_v56 }
  0x55   :  { %v168_v23 = vmul.f32 %v164_v14, %v148_v9  ;;  %v200_v24 = vmul.f32 %v192_v15, %v1023_v60  ;;  %v201_v25 = vrot.slane %v990_v36, 2  ;;  %v202_v26 = vrot.slane %v994_v39, 2 }
  0x56   :  { %v173_v27 = vrot.slane %v165_v18, 3  ;;  %v174_v28 = vrot.slane %v166_v19, 3  ;;  %v175_v29 = vrot.slane %v167_v20, 3  ;;  %v203_v30 = vrot.slane %v998_v43, 2 }
  0x57   :  { %v176_v31 = vrot.slane %v168_v23, 3  ;;  %v204_v32 = vrot.slane %v1006_v48, 2  ;;  %v209_v33 = vmul.f32 %v201_v25, %v197_v16  ;;  %v210_v34 = vmul.f32 %v202_v26, %v198_v17 }
  0x58   :  { %v181_v38 = vadd.f32 %v173_v27, %v117_v55  ;;  %v182_v40 = vadd.f32 %v174_v28, %v118_v59  ;;  %v183_v42 = vadd.f32 %v175_v29, %v119_v62  ;;  %v211_v44 = vmul.f32 %v203_v30, %v199_v21 }
  0x59   :  { %v184_v50 = vadd.f32 %v176_v31, %v120_v3  ;;  %v212_v52 = vmul.f32 %v204_v32, %v200_v24  ;;  %v224_v58 = vrot.slane %v209_v33, %v992_v37  ;;  %v228_v61 = vrot.slane %v210_v34, %v992_v37 }
  0x5a   :  { %v232_v0 = vrot.slane %v211_v44, %v992_v37  ;;  %v274_v55 = vrot.slane %v1003_v46, 2  ;;  %v275_v59 = vrot.slane %v1011_v51, 2  ;;  %v276_v62 = vrot.slane %v1017_v56, 2 }
  0x5b   :  { %v236_v1 = vrot.slane %v212_v52, %v992_v37  ;;  %v237_v2 = vmul.f32 %v224_v58, %v213_v35  ;;  %v238_v3 = vmul.f32 %v228_v61, %v214_v45  ;;  %v241_v4 = vmul.f32 %v224_v58, %v217_v49  ;;  %v300_v58 = vld [vmem:[#allocation7 + $0x30] sm:$0xe] }
  0x5c   :  { %v239_v5 = vmul.f32 %v232_v0, %v215_v47  ;;  %v242_v6 = vmul.f32 %v228_v61, %v218_v54  ;;  %v243_v7 = vmul.f32 %v232_v0, %v219_v57  ;;  %v277_v8 = vrot.slane %v1023_v60, 2  ;;  %v301_v61 = vld [vmem:[#allocation7 + $0x38] sm:$0xe] }
  0x5d   :  { %v240_v9 = vmul.f32 %v236_v1, %v216_v53  ;;  %v244_v10 = vmul.f32 %v236_v1, %v220_v63  ;;  %v254_v11 = vrot.slane %v237_v2, 6  ;;  %v255_v12 = vrot.slane %v241_v4, 6  ;;  %v299_v53 = vld [vmem:[#allocation7 + $0x28] sm:$0xe] }
  0x5e   :  { %v257_v13 = vrot.slane %v238_v3, 6  ;;  %v258_v14 = vrot.slane %v242_v6, 6  ;;  %v260_v15 = vrot.slane %v239_v5, 6  ;;  %v261_v18 = vrot.slane %v243_v7, 6 }
  0x5f   :  { %v256_v19 = vsel %vm253_vm4, %v254_v11, %v255_v12  ;;  %v263_v20 = vrot.slane %v240_v9, 6  ;;  %v264_v23 = vrot.slane %v244_v10, 6  ;;  %v282_v25 = vmul.f32 %v274_v55, %v197_v16 }
  0x60   :  { %v259_v26 = vsel %vm253_vm4, %v257_v13, %v258_v14  ;;  %v262_v27 = vsel %vm253_vm4, %v260_v15, %v261_v18  ;;  %v270_v28 = vadd.f32 %v256_v19, %v181_v38  ;;  %v283_v29 = vmul.f32 %v275_v59, %v198_v17  ;;  %v362_v18 = vld [vmem:[#allocation7 + $0x20] sm:$0x70]  ;;  %v363_v19 = vld [vmem:[#allocation7 + $0x28] sm:$0x70] }
  0x61   :  { %v265_v30 = vsel %vm253_vm4, %v263_v20, %v264_v23  ;;  %v271_v31 = vadd.f32 %v259_v26, %v182_v40  ;;  %v272_v32 = vadd.f32 %v262_v27, %v183_v42  ;;  %v284_v33 = vmul.f32 %v276_v62, %v199_v21  ;;  %v365_v26 = vld [vmem:[#allocation7 + $0x38] sm:$0x70] }
  0x62   :  { %v273_v34 = vadd.f32 %v265_v30, %v184_v50  ;;  %v285_v35 = vmul.f32 %v277_v8, %v200_v24  ;;  %v286_v44 = vrot.slane %v990_v36, 3  ;;  %v287_v45 = vrot.slane %v994_v39, 3  ;;  %v298_v50 = vld [vmem:[#allocation7 + $0x20] sm:$0xe] }
  0x63   :  { %v288_v47 = vrot.slane %v998_v43, 3  ;;  %v289_v16 = vrot.slane %v1006_v48, 3  ;;  %v338_v49 = vrot.slane %v1003_v46, 3  ;;  %v339_v38 = vrot.slane %v1011_v51, 3 }
  0x64   :  { %v294_v17 = vmul.f32 %v286_v44, %v282_v25  ;;  %v295_v52 = vmul.f32 %v287_v45, %v283_v29  ;;  %v340_v40 = vrot.slane %v1017_v56, 3  ;;  %v341_v21 = vrot.slane %v1023_v60, 3 }
  0x65   :  { %v296_v42 = vmul.f32 %v288_v47, %v284_v33  ;;  %v297_v24 = vmul.f32 %v289_v16, %v285_v35  ;;  %v346_v54 = vmul.f32 %v338_v49, %v282_v25  ;;  %v347_v57 = vmul.f32 %v339_v38, %v283_v29  ;;  %v364_v25 = vld [vmem:[#allocation7 + $0x30] sm:$0x70] }
  0x66   :  { %v305_v63 = vrot.slane %v294_v17, %v992_v37  ;;  %v309_v0 = vrot.slane %v295_v52, %v992_v37  ;;  %v348_v55 = vmul.f32 %v340_v40, %v284_v33  ;;  %v349_v59 = vmul.f32 %v341_v21, %v285_v35 }
  0x67   :  { %v313_v62 = vrot.slane %v296_v42, %v992_v37  ;;  %v317_v1 = vrot.slane %v297_v24, %v992_v37  ;;  %v350_v2 = vrot.slane %v990_v36, 4  ;;  %v351_v3 = vrot.slane %v994_v39, 4 }
  0x68   :  { %v318_v4 = vmul.f32 %v305_v63, %v298_v50  ;;  %v319_v5 = vmul.f32 %v309_v0, %v299_v53  ;;  %v352_v6 = vrot.slane %v998_v43, 4  ;;  %v353_v7 = vrot.slane %v1006_v48, 4 }
  0x69   :  { %v320_v8 = vmul.f32 %v313_v62, %v300_v58  ;;  %v321_v9 = vmul.f32 %v317_v1, %v301_v61  ;;  %v358_v10 = vmul.f32 %v350_v2, %v346_v54  ;;  %v359_v11 = vmul.f32 %v351_v3, %v347_v57 }
  0x6a   :  { %v326_v12 = vrot.slane %v318_v4, 1  ;;  %v327_v13 = vrot.slane %v319_v5, 1  ;;  %v360_v14 = vmul.f32 %v352_v6, %v348_v55  ;;  %v361_v15 = vmul.f32 %v353_v7, %v349_v59  ;;  %v426_v7 = vld [vmem:[#allocation7 + $0x20] sm:$0x80] }
  0x6b   :  { %v328_v20 = vrot.slane %v320_v8, 1  ;;  %v329_v23 = vrot.slane %v321_v9, 1  ;;  %v369_v27 = vrot.slane %v358_v10, %v992_v37  ;;  %v373_v29 = vrot.slane %v359_v11, %v992_v37  ;;  %v428_v11 = vld [vmem:[#allocation7 + $0x30] sm:$0x80] }
  0x6c   :  { %v334_v30 = vadd.f32 %v326_v12, %v270_v28  ;;  %v335_v33 = vadd.f32 %v327_v13, %v271_v31  ;;  %v377_v35 = vrot.slane %v360_v14, %v992_v37  ;;  %v381_v44 = vrot.slane %v361_v15, %v992_v37  ;;  %v430_v12 = vld [vmem:[#allocation7 + $0x40] sm:$0x3]  ;;  %v431_v13 = vld [vmem:[#allocation7 + $0x48] sm:$0x3] }
  0x6d   :  { %v336_v45 = vadd.f32 %v328_v20, %v272_v32  ;;  %v337_v47 = vadd.f32 %v329_v23, %v273_v34  ;;  %v382_v16 = vmul.f32 %v369_v27, %v362_v18  ;;  %v383_v49 = vmul.f32 %v373_v29, %v363_v19  ;;  %v429_v18 = vld [vmem:[#allocation7 + $0x38] sm:$0x80]  ;;  %v432_v19 = vld [vmem:[#allocation7 + $0x50] sm:$0x3]  ;;  %v433_v20 = vld [vmem:[#allocation7 + $0x58] sm:$0x3] }
  0x6e   :  { %v384_v38 = vmul.f32 %v377_v35, %v364_v25  ;;  %v385_v17 = vmul.f32 %v381_v44, %v365_v26  ;;  %v402_v52 = vrot.slane %v1003_v46, 4  ;;  %v403_v40 = vrot.slane %v1011_v51, 4 }
  0x6f   :  { %v390_v21 = vrot.slane %v382_v16, 4  ;;  %v391_v42 = vrot.slane %v383_v49, 4  ;;  %v404_v24 = vrot.slane %v1017_v56, 4  ;;  %v405_v28 = vrot.slane %v1023_v60, 4 }
  0x70   :  { %v392_v31 = vrot.slane %v384_v38, 4  ;;  %v393_v50 = vrot.slane %v385_v17, 4  ;;  %v410_v53 = vmul.f32 %v402_v52, %v346_v54  ;;  %v411_v58 = vmul.f32 %v403_v40, %v347_v57 }
  0x71   :  { %v398_v32 = vadd.f32 %v390_v21, %v334_v30  ;;  %v399_v34 = vadd.f32 %v391_v42, %v335_v33  ;;  %v412_v61 = vmul.f32 %v404_v24, %v348_v55  ;;  %v413_v63 = vmul.f32 %v405_v28, %v349_v59  ;;  %v427_v55 = vld [vmem:[#allocation7 + $0x28] sm:$0x80] }
  0x72   :  { %v400_v0 = vadd.f32 %v392_v31, %v336_v45  ;;  %v401_v62 = vadd.f32 %v393_v50, %v337_v47  ;;  %v414_v1 = vrot.slane %v990_v36, 5  ;;  %v415_v2 = vrot.slane %v994_v39, 5 }
  0x73   :  { %v416_v3 = vrot.slane %v998_v43, 5  ;;  %v417_v4 = vrot.slane %v1006_v48, 5  ;;  %v487_v5 = vrot.slane %v1003_v46, 5  ;;  %v488_v54 = vrot.slane %v1011_v51, 5 }
  0x74   :  { %v422_v57 = vmul.f32 %v414_v1, %v410_v53  ;;  %v423_v6 = vmul.f32 %v415_v2, %v411_v58  ;;  %v489_v59 = vrot.slane %v1017_v56, 5  ;;  %v490_v8 = vrot.slane %v1023_v60, 5 }
  0x75   :  { %v424_v9 = vmul.f32 %v416_v3, %v412_v61  ;;  %v425_v10 = vmul.f32 %v417_v4, %v413_v63  ;;  %v495_v14 = vmul.f32 %v487_v5, %v410_v53  ;;  %v496_v15 = vmul.f32 %v488_v54, %v411_v58 }
  0x76   :  { %v437_v23 = vrot.slane %v422_v57, %v992_v37  ;;  %v441_v25 = vrot.slane %v423_v6, %v992_v37  ;;  %v497_v26 = vmul.f32 %v489_v59, %v412_v61  ;;  %v498_v27 = vmul.f32 %v490_v8, %v413_v63  ;;  %v511_v8 = vld [vmem:[#allocation7 + $0x40] sm:$0x1c] }
  0x77   :  { %v445_v29 = vrot.slane %v424_v9, %v992_v37  ;;  %v449_v30 = vrot.slane %v425_v10, %v992_v37  ;;  %v499_v33 = vrot.slane %v990_v36, 6  ;;  %v500_v35 = vrot.slane %v994_v39, 6  ;;  %v512_v9 = vld [vmem:[#allocation7 + $0x48] sm:$0x1c] }
  0x78   :  { %v450_v44 = vmul.f32 %v437_v23, %v426_v7  ;;  %v451_v45 = vmul.f32 %v441_v25, %v427_v55  ;;  %v454_v47 = vmul.f32 %v437_v23, %v430_v12  ;;  %v455_v16 = vmul.f32 %v441_v25, %v431_v13  ;;  %v513_v12 = vld [vmem:[#allocation7 + $0x50] sm:$0x1c]  ;;  %v514_v13 = vld [vmem:[#allocation7 + $0x58] sm:$0x1c] }
  0x79   :  { %v452_v49 = vmul.f32 %v445_v29, %v428_v11  ;;  %v453_v38 = vmul.f32 %v449_v30, %v429_v18  ;;  %v456_v17 = vmul.f32 %v445_v29, %v432_v19  ;;  %v457_v52 = vmul.f32 %v449_v30, %v433_v20 }
  0x7a   :  { %v467_v40 = vrot.slane %v450_v44, 7  ;;  %v468_v21 = vrot.slane %v454_v47, 7  ;;  %v470_v42 = vrot.slane %v451_v45, 7  ;;  %v471_v24 = vrot.slane %v455_v16, 7 }
  0x7b   :  { %v473_v28 = vrot.slane %v452_v49, 7  ;;  %v474_v31 = vrot.slane %v456_v17, 7  ;;  %v476_v50 = vrot.slane %v453_v38, 7  ;;  %v477_v53 = vrot.slane %v457_v52, 7 }
  0x7c   :  { %v469_v58 = vsel %vm466_vm5, %v467_v40, %v468_v21  ;;  %v472_v61 = vsel %vm466_vm5, %v470_v42, %v471_v24  ;;  %v501_v63 = vrot.slane %v998_v43, 6  ;;  %v502_v1 = vrot.slane %v1006_v48, 6  ;;  %v575_v24 = vld [vmem:[#allocation7 + $0x40] sm:$0xe0] }
  0x7d   :  { %v475_v2 = vsel %vm466_vm5, %v473_v28, %v474_v31  ;;  %v478_v3 = vsel %vm466_vm5, %v476_v50, %v477_v53  ;;  %v483_v4 = vadd.f32 %v469_v58, %v398_v32  ;;  %v484_v5 = vadd.f32 %v472_v61, %v399_v34  ;;  %v576_v28 = vld [vmem:[#allocation7 + $0x48] sm:$0xe0]  ;;  %v577_v50 = vld [vmem:[#allocation7 + $0x50] sm:$0xe0] }
  0x7e   :  { %v485_v54 = vadd.f32 %v475_v2, %v400_v0  ;;  %v486_v57 = vadd.f32 %v478_v3, %v401_v62  ;;  %v507_v6 = vmul.f32 %v499_v33, %v495_v14  ;;  %v508_v7 = vmul.f32 %v500_v35, %v496_v15 }
  0x7f   :  { %v509_v55 = vmul.f32 %v501_v63, %v497_v26  ;;  %v510_v59 = vmul.f32 %v502_v1, %v498_v27  ;;  %v551_v10 = vrot.slane %v1003_v46, 6  ;;  %v552_v11 = vrot.slane %v1011_v51, 6 }
  0x80   :  { %v518_v18 = vrot.slane %v507_v6, %v992_v37  ;;  %v522_v19 = vrot.slane %v508_v7, %v992_v37  ;;  %v553_v32 = vrot.slane %v1017_v56, 6  ;;  %v554_v34 = vrot.slane %v1023_v60, 6 }
  0x81   :  { %v526_v0 = vrot.slane %v509_v55, %v992_v37  ;;  %v530_v62 = vrot.slane %v510_v59, %v992_v37  ;;  %v559_v20 = vmul.f32 %v551_v10, %v495_v14  ;;  %v560_v23 = vmul.f32 %v552_v11, %v496_v15 }
  0x82   :  { %v531_v25 = vmul.f32 %v518_v18, %v511_v8  ;;  %v532_v29 = vmul.f32 %v522_v19, %v512_v9  ;;  %v561_v30 = vmul.f32 %v553_v32, %v497_v26  ;;  %v562_v33 = vmul.f32 %v554_v34, %v498_v27 }
  0x83   :  { %v533_v35 = vmul.f32 %v526_v0, %v513_v12  ;;  %v534_v44 = vmul.f32 %v530_v62, %v514_v13  ;;  %v563_v45 = vrot.slane %v990_v36, 7  ;;  %v564_v47 = vrot.slane %v994_v39, 7  ;;  %v578_v39 = vld [vmem:[#allocation7 + $0x58] sm:$0xe0] }
  0x84   :  { %v539_v16 = vrot.slane %v531_v25, 2  ;;  %v540_v49 = vrot.slane %v532_v29, 2  ;;  %v565_v38 = vrot.slane %v998_v43, 7  ;;  %v566_v17 = vrot.slane %v1006_v48, 7 }
  0x85   :  { %v541_v52 = vrot.slane %v533_v35, 2  ;;  %v542_v40 = vrot.slane %v534_v44, 2  ;;  %v571_v14 = vmul.f32 %v563_v45, %v559_v20  ;;  %v572_v15 = vmul.f32 %v564_v47, %v560_v23 }
  0x86   :  { %v547_v21 = vadd.f32 %v539_v16, %v483_v4  ;;  %v548_v42 = vadd.f32 %v540_v49, %v484_v5  ;;  %v573_v26 = vmul.f32 %v565_v38, %v561_v30  ;;  %v574_v27 = vmul.f32 %v566_v17, %v562_v33 }
  0x87   :  { %v549_v31 = vadd.f32 %v541_v52, %v485_v54  ;;  %v550_v36 = vadd.f32 %v542_v40, %v486_v57  ;;  %v582_v53 = vrot.slane %v571_v14, %v992_v37  ;;  %v586_v43 = vrot.slane %v572_v15, %v992_v37 }
  0x88   :  { %v590_v48 = vrot.slane %v573_v26, %v992_v37  ;;  %v594_v58 = vrot.slane %v574_v27, %v992_v37  ;;  %v615_v61 = vrot.slane %v1003_v46, 7  ;;  %v616_v63 = vrot.slane %v1011_v51, 7 }
  0x89   :  { %v595_v1 = vmul.f32 %v582_v53, %v575_v24  ;;  %v596_v2 = vmul.f32 %v586_v43, %v576_v28  ;;  %v617_v3 = vrot.slane %v1017_v56, 7  ;;  %v618_v4 = vrot.slane %v1023_v60, 7 }
  0x8a   :  { %v597_v5 = vmul.f32 %v590_v48, %v577_v50  ;;  %v598_v54 = vmul.f32 %v594_v58, %v578_v39  ;;  %v623_v57 = vmul.f32 %v615_v61, %v559_v20  ;;  %v624_v6 = vmul.f32 %v616_v63, %v560_v23 }
  0x8b   :  { %v603_v7 = vrot.slane %v595_v1, 5  ;;  %v604_v55 = vrot.slane %v596_v2, 5  ;;  %v625_v59 = vmul.f32 %v617_v3, %v561_v30  ;;  %v626_v8 = vmul.f32 %v618_v4, %v562_v33 }
  0x8c   :  { %v605_v9 = vrot.slane %v597_v5, 5  ;;  %v606_v37 = vrot.slane %v598_v54, 5  ;;  %v673_v10 = vrot.slane %v623_v57, 7  ;;  %v674_v46 = vrot.slane %v624_v6, 7 }
  0x8d   :  { %v611_v11 = vadd.f32 %v603_v7, %v547_v21  ;;  %v612_v51 = vadd.f32 %v604_v55, %v548_v42  ;;  %v675_v12 = vrot.slane %v625_v59, 7  ;;  %v676_v13 = vrot.slane %v626_v8, 7 }
  0x8e   :  { %v613_v18 = vadd.f32 %v605_v9, %v549_v31  ;;  %v614_v56 = vadd.f32 %v606_v37, %v550_v36  ;;  %v716_v19 = vrot.slane %v623_v57, 6  ;;  %v717_v60 = vrot.slane %v624_v6, 6 }
  0x8f   :  { %v627_v32 = vmul.f32 0.5, %v611_v11  ;;  %v628_v34 = vmul.f32 0.5, %v612_v51  ;;  %v718_v0 = vrot.slane %v625_v59, 6  ;;  %v719_v62 = vrot.slane %v626_v8, 6 }
  0x90   :  { %v629_v20 = vmul.f32 0.5, %v613_v18  ;;  %v630_v23 = vmul.f32 0.5, %v614_v56  ;;  %v760_v25 = vsub.f32 1.0, %v623_v57  ;;  %v761_v29 = vsub.f32 1.0, %v624_v6 }
  0x91   :  { %v631_v30 = vadd.f32 %v627_v32, %v623_v57  ;;  %v632_v33 = vadd.f32 %v628_v34, %v624_v6  ;;  %v681_v35 = vadd.f32 %v673_v10, %v627_v32  ;;  %v682_v44 = vadd.f32 %v674_v46, %v628_v34 }
  0x92   :  { %v633_v45 = vadd.f32 %v629_v20, %v625_v59  ;;  %v634_v47 = vadd.f32 %v630_v23, %v626_v8  ;;  %v683_v16 = vadd.f32 %v675_v12, %v629_v20  ;;  %v684_v49 = vadd.f32 %v676_v13, %v630_v23 }
  0x93   :  { %v639_v38 = vcombine.low %v631_v30, %v632_v33  ;;  %v689_v17 = vcombine.low %v681_v35, %v682_v44  ;;  %v724_v52 = vadd.f32 %v716_v19, %v627_v32  ;;  %v725_v40 = vadd.f32 %v717_v60, %v628_v34 }
  0x94   :  { %v640_v14 = vcombine.low %v633_v45, %v634_v47  ;;  %v690_v15 = vcombine.low %v683_v16, %v684_v49  ;;  %v726_v21 = vadd.f32 %v718_v0, %v629_v20  ;;  %v727_v42 = vadd.f32 %v719_v62, %v630_v23 }
  0x95   :  { %v647_v26 = vrot.slane %v639_v38, %v996_v41  ;;  %v697_v27 = vrot.slane %v689_v17, %v996_v41  ;;  %v732_v24 = vcombine.low %v724_v52, %v725_v40  ;;  %v762_v28 = vsub.f32 1.0, %v625_v59 }
  0x96   :  { %v654_v31 = vrot.slane %v640_v14, %v996_v41  ;;  %v704_v36 = vrot.slane %v690_v15, %v996_v41  ;;  %v733_v50 = vcombine.low %v726_v21, %v727_v42  ;;  %v763_v39 = vsub.f32 1.0, %v626_v8 }
  0x97   :  { %v740_v53 = vrot.slane %v732_v24, %v996_v41  ;;  %v768_v43 = vcombine.low %v760_v25, %v761_v29 }
  0x98   :  { %v655_v48 = vcombine.low %v647_v26, %v654_v31  ;;  %v705_v58 = vcombine.high %v697_v27, %v704_v36  ;;  %v747_v61 = vrot.slane %v733_v50, %v996_v41  ;;  %v769_v63 = vcombine.low %v762_v28, %v763_v39 }
  0x99   :  { %v776_v2 = vrot.slane %v768_v43, %v996_v41 }
  0x9a   :  { %v662_v3 = vrot.slane %v655_v48, %v996_v41  ;;  %v712_v4 = vrot.slane %v705_v58, %v996_v41  ;;  %v748_v5 = vcombine.low %v740_v53, %v747_v61  ;;  %v783_v54 = vrot.slane %v769_v63, %v996_v41 }
  0x9c   :  { %668 = vst.msk [vmem:[#allocation8] ss:$4 sm:$0xf] %vm1129_vm6, %v662_v3  ;;  %715 = vst.msk [vmem:[#allocation8 + $0x1] ss:$4 sm:$0xf] %vm1129_vm6, %v712_v4  ;;  %v755_v22 = vrot.slane %v748_v5, %v996_v41  ;;  %v784_v57 = vcombine.low %v776_v2, %v783_v54 }
  0x9e   :  { %v756_v6 = vcombine.high %v755_v22, %v755_v22  ;;  %v791_v7 = vrot.slane %v784_v57, %v996_v41 }
  0xa0   :  { %759 = vst.msk [vmem:[#allocation8 + $0x2] ss:$4 sm:$0xf] %vm1129_vm6, %v756_v6  ;;  %794 = vst.msk [vmem:[#allocation8 + $0x3] ss:$4 sm:$0xf] %vm1129_vm6, %v791_v7 }
  0xa1   :  { %908 = shalt.err (!%p905_p0)
}
  0xa2   :  { %s909_s25 = scalar_lea.hbm %s1162_s3, 256 }
  0xa3   :  { %p910_p1 = scmp.ne.s32.totalorder %s1162_s3, %s909_s25  ;;  %p913_p2 = scmp.lt.u32.totalorder %s909_s25, %s1162_s3 }
  0xa5   :  { %p915_p3 = pnand %p913_p2, %p910_p1 }
  0xa7   :  { %918 = shalt.err (!%p915_p3)
}
  0xa8   :  { %804 = dma.vmem_to_hbm [thread:$0]  %s802_s21, 256, %s1162_s3, [#allocation4]  }
  0xa9   :  { %923 = dma.done.wait [#allocation4], 256  }
  0xaa   :  { %924 = vsyncadd [#allocation4], 4294967040 }
  0xab   :  { %808 = vsyncpa [#allocation3], 1 }
  0xac   :  { %809 = vsyncpa [#allocation6], 1 }
  0xad   :  { %810 = vsyncpa [#allocation4], 1 }

</bundles_post_ra>
